<compile_context>
chip_gen: v6e
topology: v6e:2x2x1
jax: 0.10.0
libtpu: 0.0.40
codegen_flags: <defaults>
</compile_context>

<pallas_src>
import functools

import jax
import jax.numpy as jnp
from jax.experimental import pallas as pl
from jax.experimental.pallas import tpu as pltpu


def _dice_sums_kernel(p_ref, t_ref, o_ref, tp_acc, p_acc, t_acc):
    """Accumulates per-class lane-wise partial sums of tp / pred / true.

    p_ref, t_ref : (C, TILE_HW) tile of one batch element (leading dim squeezed)
    o_ref        : (C, 3) per-batch output: [:,0]=tp, [:,1]=sum(pred), [:,2]=sum(true)
    *_acc        : (C, TILE_HW) f32 VMEM accumulators, live across the spatial axis
    """
    s = pl.program_id(1)

    @pl.when(s == 0)
    def _():
        tp_acc[...] = jnp.zeros_like(tp_acc)
        p_acc[...] = jnp.zeros_like(p_acc)
        t_acc[...] = jnp.zeros_like(t_acc)

    p = p_ref[...].astype(jnp.float32)
    t = t_ref[...].astype(jnp.float32)

    # Pure VPU, full vreg width; hidden under the HBM->VMEM DMA of the next tile.
    tp_acc[...] += p * t
    p_acc[...] += p
    t_acc[...] += t

    @pl.when(s == pl.num_programs(1) - 1)
    def _():
        # Single cross-lane reduce + tiny store, once per batch element.
        o_ref[:, 0:1] = jnp.sum(tp_acc[...], axis=1, keepdims=True)
        o_ref[:, 1:2] = jnp.sum(p_acc[...], axis=1, keepdims=True)
        o_ref[:, 2:3] = jnp.sum(t_acc[...], axis=1, keepdims=True)


def _round_up(a, b):
    return ((a + b - 1) // b) * b


def dice_loss(y_pred, y_true, *, beta=1.0, smooth=1e-5,
              class_weights=None, class_indexes=None):
    """Dice loss matching the PyTorch DiceLoss.forward. Inputs: (N, C, H, W)."""
    assert y_pred.shape == y_true.shape and y_pred.ndim == 4

    if class_indexes is not None:
        # Channel-select in the wrapper (functional equivalent of the module's gather).
        idx = jnp.asarray(class_indexes, dtype=jnp.int32)
        y_pred = jnp.take(y_pred, idx, axis=1)
        y_true = jnp.take(y_true, idx, axis=1)

    N, C, H, W = y_pred.shape
    hw = H * W
    LANE = 128

    # Lane-dense flatten in the wrapper (contiguous reshape, no relayout).
    p2 = y_pred.reshape(N, C, hw)
    t2 = y_true.reshape(N, C, hw)

    # Spatial tile: ~2 MiB of f32 per input per buffer, lane width multiple of 128.
    target_bytes = 2 * 1024 * 1024
    tile_hw = max(LANE, ((target_bytes // (C * 4)) // LANE) * LANE)
    if hw <= tile_hw:
        tile_hw = _round_up(hw, LANE)
    hw_padded = _round_up(hw, tile_hw)
    if hw_padded != hw:
        pad = hw_padded - hw
        # Zero padding contributes 0 to every accumulated sum.
        p2 = jnp.pad(p2, ((0, 0), (0, 0), (0, pad)))
        t2 = jnp.pad(t2, ((0, 0), (0, 0), (0, pad)))
    num_s = hw_padded // tile_hw

    sums = pl.pallas_call(
        _dice_sums_kernel,
        out_shape=jax.ShapeDtypeStruct((N, C, 3), jnp.float32),
        grid_spec=pltpu.PrefetchScalarGridSpec(
            num_scalar_prefetch=0,
            grid=(N, num_s),
            in_specs=[
                pl.BlockSpec((None, C, tile_hw), lambda n, s: (n, 0, s)),
                pl.BlockSpec((None, C, tile_hw), lambda n, s: (n, 0, s)),
            ],
            out_specs=pl.BlockSpec((None, C, 3), lambda n, s: (n, 0, 0)),
            scratch_shapes=[
                pltpu.VMEM((C, tile_hw), jnp.float32),
                pltpu.VMEM((C, tile_hw), jnp.float32),
                pltpu.VMEM((C, tile_hw), jnp.float32),
            ],
        ),
        compiler_params=pltpu.CompilerParams(
            # Batch axis has no carried state -> parallel (2x on v7x megacore);
            # spatial axis carries the VMEM accumulators -> arbitrary.
            dimension_semantics=("parallel", "arbitrary"),
            vmem_limit_bytes=32 * 1024 * 1024,
        ),
    )(p2, t2)

    # Tiny O(C) epilogue in plain JAX (exactly mirrors the PyTorch math).
    per_class = jnp.sum(sums, axis=0)            # (C, 3): reduce over batch
    tp = per_class[:, 0]
    p_sum = per_class[:, 1]
    t_sum = per_class[:, 2]
    fp = p_sum - tp
    fn = t_sum - tp
    beta2 = float(beta) ** 2
    dice = ((1.0 + beta2) * tp + smooth) / ((1.0 + beta2) * tp + beta2 * fn + fp + smooth)
    if class_weights is not None:
        dice = dice * jnp.asarray(class_weights, dtype=dice.dtype)
    return 1.0 - jnp.mean(dice)


def _reference_loss(y_pred, y_true, *, beta=1.0, smooth=1e-5,
                    class_weights=None, class_indexes=None):
    # Pure-JAX reference mirroring the PyTorch module exactly.
    if class_indexes is not None:
        idx = jnp.asarray(class_indexes, dtype=jnp.int32)
        y_pred = jnp.take(y_pred, idx, axis=1)
        y_true = jnp.take(y_true, idx, axis=1)
    axes = (0, 2, 3)
    tp = jnp.sum(y_true * y_pred, axis=axes)
    fp = jnp.sum(y_pred, axis=axes) - tp
    fn = jnp.sum(y_true, axis=axes) - tp
    beta2 = float(beta) ** 2
    dice = ((1.0 + beta2) * tp + smooth) / ((1.0 + beta2) * tp + beta2 * fn + fp + smooth)
    if class_weights is not None:
        dice = dice * jnp.asarray(class_weights, dtype=dice.dtype)
    return 1.0 - jnp.mean(dice)


def _close(a, b, tol=1e-5):
    a, b = float(a), float(b)
    return abs(a - b) <= tol + tol * abs(b)


if __name__ == "__main__":
    N, C, H, W = 2, 4, 16, 16

    key = jax.random.PRNGKey(0)
    k_p, k_t = jax.random.split(key)

    # Typical segmentation setup: probabilistic predictions + one-hot targets.
    logits = jax.random.normal(k_p, (N, C, H, W), dtype=jnp.float32)
    y_pred = jax.nn.softmax(logits, axis=1)
    labels = jax.random.randint(k_t, (N, H, W), 0, C)
    y_true = jax.nn.one_hot(labels, C, axis=1, dtype=jnp.float32)  # (N, C, H, W)

    # Default parameters (beta=1, smooth=1e-5, class_weights -> multiply by 1).
    loss = jax.block_until_ready(dice_loss(y_pred, y_true))
    ref = jax.block_until_ready(_reference_loss(y_pred, y_true))
    assert _close(loss, ref), (float(loss), float(ref))

    # Non-default beta / class_weights path.
    cw = [0.5, 1.0, 1.5, 2.0]
    loss2 = jax.block_until_ready(dice_loss(y_pred, y_true, beta=2.0, class_weights=cw))
    ref2 = jax.block_until_ready(_reference_loss(y_pred, y_true, beta=2.0, class_weights=cw))
    assert _close(loss2, ref2), (float(loss2), float(ref2))

    print("KERNEL_OK")
</pallas_src>

<mosaic_0001>
module attributes {stable_mosaic.version = 11 : i64} {
  func.func @_dice_sums_kernel(%arg0: i32, %arg1: i32, %arg2: memref<1x4x256xf32, #tpu.memory_space<vmem>>, %arg3: memref<1x4x256xf32, #tpu.memory_space<vmem>>, %arg4: memref<1x4x3xf32, #tpu.memory_space<vmem>>, %arg5: memref<4x256xf32, #tpu.memory_space<vmem>>, %arg6: memref<4x256xf32, #tpu.memory_space<vmem>>, %arg7: memref<4x256xf32, #tpu.memory_space<vmem>>) attributes {dimension_semantics = [#tpu.dimension_semantics<parallel>, #tpu.dimension_semantics<arbitrary>], iteration_bounds = array<i64: 2, 1>, scalar_prefetch = 0 : i64, scratch_operands = 3 : i64, tpu.core_type = #tpu.core_type<tc>, window_params = [{transform_indices = @transform_0, window_bounds = array<i64: 1, 4, 256>}, {transform_indices = @transform_1, window_bounds = array<i64: 1, 4, 256>}, {transform_indices = @transform_2, window_bounds = array<i64: 1, 4, 3>}]} {
    %c0_i32 = arith.constant 0 : i32
    %0 = arith.cmpi eq, %arg1, %c0_i32 : i32
    %1 = arith.extui %0 : i1 to i32
    %c0_i32_0 = arith.constant 0 : i32
    %2 = arith.cmpi ne, %1, %c0_i32_0 : i32
    scf.if %2 {
      %cst = arith.constant 0.000000e+00 : f32
      %20 = vector.broadcast %cst : f32 to vector<4x256xf32>
      %c0_20 = arith.constant 0 : index
      %c0_21 = arith.constant 0 : index
      %21 = vector.load %arg5[%c0_20, %c0_21] : memref<4x256xf32, #tpu.memory_space<vmem>>, vector<4x256xf32>
      tpu.vector_store %arg5[%c0_20, %c0_21], %20 {strides = array<i32>} : memref<4x256xf32, #tpu.memory_space<vmem>>, vector<4x256xf32>,
      %cst_22 = arith.constant 0.000000e+00 : f32
      %22 = vector.broadcast %cst_22 : f32 to vector<4x256xf32>
      %c0_23 = arith.constant 0 : index
      %c0_24 = arith.constant 0 : index
      %23 = vector.load %arg6[%c0_23, %c0_24] : memref<4x256xf32, #tpu.memory_space<vmem>>, vector<4x256xf32>
      tpu.vector_store %arg6[%c0_23, %c0_24], %22 {strides = array<i32>} : memref<4x256xf32, #tpu.memory_space<vmem>>, vector<4x256xf32>,
      %cst_25 = arith.constant 0.000000e+00 : f32
      %24 = vector.broadcast %cst_25 : f32 to vector<4x256xf32>
      %c0_26 = arith.constant 0 : index
      %c0_27 = arith.constant 0 : index
      %25 = vector.load %arg7[%c0_26, %c0_27] : memref<4x256xf32, #tpu.memory_space<vmem>>, vector<4x256xf32>
      tpu.vector_store %arg7[%c0_26, %c0_27], %24 {strides = array<i32>} : memref<4x256xf32, #tpu.memory_space<vmem>>, vector<4x256xf32>,
    } else {
    }
    %c0 = arith.constant 0 : index
    %c0_1 = arith.constant 0 : index
    %c0_2 = arith.constant 0 : index
    %3 = vector.load %arg2[%c0, %c0_1, %c0_2] : memref<1x4x256xf32, #tpu.memory_space<vmem>>, vector<1x4x256xf32>
    %4 = vector.shape_cast %3 : vector<1x4x256xf32> to vector<4x256xf32>
    %c0_3 = arith.constant 0 : index
    %c0_4 = arith.constant 0 : index
    %c0_5 = arith.constant 0 : index
    %5 = vector.load %arg3[%c0_3, %c0_4, %c0_5] : memref<1x4x256xf32, #tpu.memory_space<vmem>>, vector<1x4x256xf32>
    %6 = vector.shape_cast %5 : vector<1x4x256xf32> to vector<4x256xf32>
    %c0_6 = arith.constant 0 : index
    %c0_7 = arith.constant 0 : index
    %7 = vector.load %arg5[%c0_6, %c0_7] : memref<4x256xf32, #tpu.memory_space<vmem>>, vector<4x256xf32>
    %8 = arith.mulf %4, %6 : vector<4x256xf32>
    %9 = arith.addf %7, %8 : vector<4x256xf32>
    %c0_8 = arith.constant 0 : index
    %c0_9 = arith.constant 0 : index
    %10 = vector.load %arg5[%c0_8, %c0_9] : memref<4x256xf32, #tpu.memory_space<vmem>>, vector<4x256xf32>
    tpu.vector_store %arg5[%c0_8, %c0_9], %9 {strides = array<i32>} : memref<4x256xf32, #tpu.memory_space<vmem>>, vector<4x256xf32>,
    %c0_10 = arith.constant 0 : index
    %c0_11 = arith.constant 0 : index
    %11 = vector.load %arg6[%c0_10, %c0_11] : memref<4x256xf32, #tpu.memory_space<vmem>>, vector<4x256xf32>
    %12 = arith.addf %11, %4 : vector<4x256xf32>
    %c0_12 = arith.constant 0 : index
    %c0_13 = arith.constant 0 : index
    %13 = vector.load %arg6[%c0_12, %c0_13] : memref<4x256xf32, #tpu.memory_space<vmem>>, vector<4x256xf32>
    tpu.vector_store %arg6[%c0_12, %c0_13], %12 {strides = array<i32>} : memref<4x256xf32, #tpu.memory_space<vmem>>, vector<4x256xf32>,
    %c0_14 = arith.constant 0 : index
    %c0_15 = arith.constant 0 : index
    %14 = vector.load %arg7[%c0_14, %c0_15] : memref<4x256xf32, #tpu.memory_space<vmem>>, vector<4x256xf32>
    %15 = arith.addf %14, %6 : vector<4x256xf32>
    %c0_16 = arith.constant 0 : index
    %c0_17 = arith.constant 0 : index
    %16 = vector.load %arg7[%c0_16, %c0_17] : memref<4x256xf32, #tpu.memory_space<vmem>>, vector<4x256xf32>
    tpu.vector_store %arg7[%c0_16, %c0_17], %15 {strides = array<i32>} : memref<4x256xf32, #tpu.memory_space<vmem>>, vector<4x256xf32>,
    %c0_i32_18 = arith.constant 0 : i32
    %17 = arith.cmpi eq, %arg1, %c0_i32_18 : i32
    %18 = arith.extui %17 : i1 to i32
    %c0_i32_19 = arith.constant 0 : i32
    %19 = arith.cmpi ne, %18, %c0_i32_19 : i32
    scf.if %19 {
      %c0_20 = arith.constant 0 : index
      %c0_21 = arith.constant 0 : index
      %20 = vector.load %arg5[%c0_20, %c0_21] : memref<4x256xf32, #tpu.memory_space<vmem>>, vector<4x256xf32>
      %cst = arith.constant dense<0.000000e+00> : vector<4xf32>
      %21 = vector.multi_reduction <add>, %20, %cst [1] : vector<4x256xf32> to vector<4xf32>
      %22 = vector.shape_cast %21 : vector<4xf32> to vector<4x1xf32>
      %c0_22 = arith.constant 0 : index
      %c0_23 = arith.constant 0 : index
      %c0_24 = arith.constant 0 : index
      %23 = vector.load %arg4[%c0_22, %c0_23, %c0_24] : memref<1x4x3xf32, #tpu.memory_space<vmem>>, vector<1x4x1xf32>
      %24 = vector.shape_cast %23 : vector<1x4x1xf32> to vector<4x1xf32>
      %25 = vector.shape_cast %22 : vector<4x1xf32> to vector<1x4x1xf32>
      tpu.vector_store %arg4[%c0_22, %c0_23, %c0_24], %25 {strides = array<i32>} : memref<1x4x3xf32, #tpu.memory_space<vmem>>, vector<1x4x1xf32>,
      %c0_25 = arith.constant 0 : index
      %c0_26 = arith.constant 0 : index
      %26 = vector.load %arg6[%c0_25, %c0_26] : memref<4x256xf32, #tpu.memory_space<vmem>>, vector<4x256xf32>
      %cst_27 = arith.constant dense<0.000000e+00> : vector<4xf32>
      %27 = vector.multi_reduction <add>, %26, %cst_27 [1] : vector<4x256xf32> to vector<4xf32>
      %28 = vector.shape_cast %27 : vector<4xf32> to vector<4x1xf32>
      %c0_28 = arith.constant 0 : index
      %c0_29 = arith.constant 0 : index
      %c1 = arith.constant 1 : index
      %29 = vector.load %arg4[%c0_28, %c0_29, %c1] : memref<1x4x3xf32, #tpu.memory_space<vmem>>, vector<1x4x1xf32>
      %30 = vector.shape_cast %29 : vector<1x4x1xf32> to vector<4x1xf32>
      %31 = vector.shape_cast %28 : vector<4x1xf32> to vector<1x4x1xf32>
      tpu.vector_store %arg4[%c0_28, %c0_29, %c1], %31 {strides = array<i32>} : memref<1x4x3xf32, #tpu.memory_space<vmem>>, vector<1x4x1xf32>,
      %c0_30 = arith.constant 0 : index
      %c0_31 = arith.constant 0 : index
      %32 = vector.load %arg7[%c0_30, %c0_31] : memref<4x256xf32, #tpu.memory_space<vmem>>, vector<4x256xf32>
      %cst_32 = arith.constant dense<0.000000e+00> : vector<4xf32>
      %33 = vector.multi_reduction <add>, %32, %cst_32 [1] : vector<4x256xf32> to vector<4xf32>
      %34 = vector.shape_cast %33 : vector<4xf32> to vector<4x1xf32>
      %c0_33 = arith.constant 0 : index
      %c0_34 = arith.constant 0 : index
      %c2 = arith.constant 2 : index
      %35 = vector.load %arg4[%c0_33, %c0_34, %c2] : memref<1x4x3xf32, #tpu.memory_space<vmem>>, vector<1x4x1xf32>
      %36 = vector.shape_cast %35 : vector<1x4x1xf32> to vector<4x1xf32>
      %37 = vector.shape_cast %34 : vector<4x1xf32> to vector<1x4x1xf32>
      tpu.vector_store %arg4[%c0_33, %c0_34, %c2], %37 {strides = array<i32>} : memref<1x4x3xf32, #tpu.memory_space<vmem>>, vector<1x4x1xf32>,
    } else {
    }
    return
  }
  func.func @transform_0(%arg0: i32, %arg1: i32) -> (i32, i32, i32) {
    %c0_i32 = arith.constant 0 : i32
    %c0_i32_0 = arith.constant 0 : i32
    return %arg0, %c0_i32, %arg1 : i32, i32, i32
  }
  func.func @transform_1(%arg0: i32, %arg1: i32) -> (i32, i32, i32) {
    %c0_i32 = arith.constant 0 : i32
    %c0_i32_0 = arith.constant 0 : i32
    return %arg0, %c0_i32, %arg1 : i32, i32, i32
  }
  func.func @transform_2(%arg0: i32, %arg1: i32) -> (i32, i32, i32) {
    %c0_i32 = arith.constant 0 : i32
    %c0_i32_0 = arith.constant 0 : i32
    %c0_i32_1 = arith.constant 0 : i32
    return %arg0, %c0_i32, %c0_i32_0 : i32, i32, i32
  }
}

</mosaic_0001>

<bundles_post_ra>
// kernel: tpu_custom_call.1
= control target key start
LH: loop header
LB: loop body
LE: loop exit
PB: predicated region body
PF: predicated region fallthrough
CT: control target
= control target key end

     0   :  { %7 = vsyncpa [#allocation6], 0  ;;  %s713_s0 = inlined_call_operand.hbm [shape: f32[2,4,256], index: 0, kind: input, shape index: {}]   ;;  %s714_s1 = inlined_call_operand.hbm [shape: f32[2,4,256], index: 1, kind: input, shape index: {}]   ;;  %s715_s2 = inlined_call_operand.vmem [shape: f32[2,4,3], index: 2, kind: output, shape index: {}]  }
   0x1   :  { %9 = vsyncpa [#allocation6 + $0x1], 0 }
   0x2   :  { %10 = vsyncpa [#allocation8], 0 }
   0x3   :  { %12 = vsyncpa [#allocation8 + $0x1], 0  ;;  %s587_s9 = smov 0   ;;  %s589_s10 = smov 0  }
   0x4   :  { %s591_s11 = smov 0   ;;  %s593_s12 = smov 0  }
   0x5   :  { %s595_s13 = smov 0   ;;  %s597_s14 = smov 0  }
   0x6 LB: > { %s378_s15 = sadd.s32 4294967295, %s568_s14   ;;  %s30_s16 = sadd.s32 1, %s564_s13  ;;  %s568_s14 = sphi %s597_s14, %s18_s14   ;;  %s564_s13 = sphi %s595_s13, %s724_s13   ;;  %s560_s12 = sphi %s593_s12, %s723_s12   ;;  %s556_s11 = sphi %s591_s11, %s722_s11   ;;  %s552_s10 = sphi %s589_s10, %s721_s10   ;;  %s548_s9 = sphi %s587_s9, %s720_s9  }
   0x7   : > { %p32_p0 = scmp.ge.s32.totalorder %s30_s16, 2  ;;  %s39_s17 = sadd.s32 1, %s556_s11 }
   0x8   : > { %p46_p1 = scmp.ne.s32.totalorder %s556_s11, %s552_s10  ;;  %p47_p2 = scmp.eq.s32.totalorder %s568_s14, 0 }
   0x9   : > { %s726_s16 = smov (%p32_p0, %s30_s16), 0  ;;  %p52_p4 = scmp.ne.s32.totalorder %s552_s10, %s548_s9 }
   0xa   : > { %p623_p3 = por %p47_p2, %p46_p1  ;;  %s34_s19 = ssub.s32 %s564_s13, %s726_s16 }
   0xb   : > { %p53_p5 = scmp.eq.s32.totalorder %s378_s15, 0  ;;  %p37_p6 = scmp.eq.s32.totalorder %s34_s19, 0 }
   0xc   : > { %p407_p8 = scmp.lt.s32.totalorder %s568_s14, 2  ;;  %s639_s22 = sand.u32 1, %s556_s11  }
   0xd   : > { %p630_p7 = por %p53_p5, %p52_p4  ;;  %s394_s23 = sshll.u32 %s564_s13, 7 }
   0xe   : > { %s636_s21 = scalar_select %p37_p6, %s556_s11, %s39_s17  }
   0xf   : > { %s382_s24 = sshll.u32 %s639_s22, 3  ;;  %s142_s27 = scalar_lea.hbm %s713_s0, %s394_s23 }
  0x10   : > { %s134_s28 = scalar_lea.vmem [#allocation5], %s382_s24  ;;  %p648_p9 = pnand %p407_p8, %p623_p3 }
  0x11   : > { %s144_s29 = sshll.u32 %s134_s28, 4  ;;  %p388_p10 = scmp.ge.s32.totalorder %s568_s14, 1  ;;  %s145_s29 = int_to_ptr.vmem [resolvable:$true] %s144_s29 }
  0x12   : > { %p170_p11 = scmp.lt.s32.totalorder %s568_s14, 3  ;;  %s131_s3 = scalar_lea.sflag [#allocation6], %s639_s22 }
  0x13   : > { %p460_p12 = pneg %p648_p9  ;;  %s471_s4 = scalar_lea.vmem %s145_s29, 128 }
  0x14   : > { %p472_p13 = scmp.ne.s32.totalorder %s145_s29, %s471_s4  ;;  %s570_s5 = smov [#allocation5]  }
  0x15   : > { %s476_s6 = sshll.u32 %s570_s5, 4  ;;  %s477_s6 = int_to_ptr.vmem [resolvable:$false] %s476_s6 }
  0x16   : > { %p474_p0 = pnand %p472_p13, %p460_p12  ;;  %s478_s7 = scalar_lea.vmem %s477_s6, 256 }
  0x17   : > { %p479_p2 = scmp.lt.s32.totalorder %s145_s29, %s477_s6  ;;  %p480_p3 = scmp.lt.s32.totalorder %s478_s7, %s471_s4 }
  0x18   : > { %p475_p1 = pneg %p474_p0 }
  0x19   : > { %p481_p4 = por %p480_p3, %p479_p2 }
  0x1b   : > { %p482_p5 = pnand %p481_p4, %p475_p1 }
  0x1d   : > { %485 = shalt.err (!%p482_p5)
}
  0x1e   : > { %403 = dma.hbm_to_vmem [thread:$0]  (!%p648_p9), %s142_s27, 128, %s145_s29, %s131_s3  }
  0x1f   : > { %p666_p6 = pnand %p388_p10, %p170_p11  ;;  %s163_s17 = scalar_lea.hbm %s714_s1, %s394_s23 }
  0x20   : > { %s155_s18 = scalar_lea.vmem [#allocation7], %s382_s24  ;;  %s152_s25 = scalar_lea.sflag [#allocation8], %s639_s22 }
  0x21   : > { %s165_s19 = sshll.u32 %s155_s18, 4  ;;  %s571_s27 = smov [#allocation7]   ;;  %s166_s19 = int_to_ptr.vmem [resolvable:$true] %s165_s19 }
  0x22   : > { %s499_s26 = scalar_lea.vmem %s166_s19, 128  ;;  %s504_s28 = sshll.u32 %s571_s27, 4  ;;  %s505_s28 = int_to_ptr.vmem [resolvable:$false] %s504_s28 }
  0x23   : > { %p500_p8 = scmp.ne.s32.totalorder %s166_s19, %s499_s26  ;;  %s506_s29 = scalar_lea.vmem %s505_s28, 256 }
  0x24   : > { %p507_p10 = scmp.lt.s32.totalorder %s166_s19, %s505_s28  ;;  %p508_p11 = scmp.lt.s32.totalorder %s506_s29, %s499_s26 }
  0x25   : > { %p502_p13 = pnand %p500_p8, %p460_p12 }
  0x26   : > { %p509_p1 = por %p508_p11, %p507_p10 }
  0x27   : > { %p503_p0 = pneg %p502_p13 }
  0x29   : > { %p510_p2 = pnand %p509_p1, %p503_p0 }
  0x2b   : > { %513 = shalt.err (!%p510_p2)
}
  0x2c   : > { %406 = dma.hbm_to_vmem [thread:$0]  (!%p648_p9), %s163_s17, 128, %s166_s19, %s152_s25  }
  0x2d   : > { %174 = sbr.rel (%p666_p6) target bundleno = 205 (0xcd), region = 28  ;;  %s176_s22 = sand.u32 (!%p666_p6), 1, %s552_s10  }
  0x2e   : > { %s389_s23 = sshll.u32 (!%p666_p6), %s176_s22, 3  ;;  %s177_s24 = scalar_lea.sflag (!%p666_p6), [#allocation6], %s176_s22 }
  0x2f   : > { %s180_s3 = scalar_lea.vmem (!%p666_p6), [#allocation5], %s389_s23 }
  0x32   : > { %539 = dma.done.wait (%p630_p7), %s177_s24, 128  }
  0x33   : > { %541 = vsyncadd (%p630_p7), %s177_s24, 4294967168  ;;  %s186_s4 = scalar_lea.sflag [#allocation8], %s176_s22  ;;  %s189_s5 = scalar_lea.vmem [#allocation7], %s389_s23 }
  0x34   : > { %543 = dma.done.wait (%p630_p7), %s186_s4, 128  }
  0x35   : > { %545 = vsyncadd (%p630_p7), %s186_s4, 4294967168  ;;  %v227_v0 = vld [vmem:[%s180_s3] sm:$0xff]  ;;  %v228_v1 = vld [vmem:[%s189_s5] sm:$0xff]  ;;  %vm246_vm0 = vcmask 1043456   ;;  %p216_p7 = scmp.lt.s32.totalorder %s560_s12, 1  ;;  %vm252_vm1 = vcmask 3072  }
  0x36   : > { %v230_v2 = vmul.f32 %v228_v1, %v227_v0  ;;  %v256_v3 = vcombine.high %v227_v0, %v227_v0  ;;  %v267_v4 = vcombine.high %v228_v1, %v228_v1  ;;  %v269_v5 = vsel %vm246_vm0, %v228_v1, 0.0 }
  0x37   : > { %v258_v11 = vsel %vm246_vm0, %v227_v0, 0.0  ;;  %s728_s12 = smov (!%p216_p7, %s560_s12), 1  ;;  %vm263_vm2 = vcmask 11272   ;;  %vm274_vm3 = vcmask 19472  }
  0x38   : > { %v244_v6 = vcombine.high %v230_v2, %v230_v2  ;;  %v247_v7 = vsel %vm246_vm0, %v230_v2, 0.0  ;;  %v270_v8 = vsel %vm246_vm0, %v267_v4, 0.0  ;;  %v259_v12 = vsel %vm246_vm0, %v256_v3, 0.0  ;;  %s391_s20 = sshll.u32 %s728_s12, 2 }
  0x39   : > { %v271_v9 = vadd.f32 %v270_v8, %v269_v5  ;;  %v260_v14 = vadd.f32 %v259_v12, %v258_v11  ;;  %s219_s7 = scalar_lea.vmem %s715_s2, %s391_s20 }
  0x3a   : > { %v248_v10 = vsel %vm246_vm0, %v244_v6, 0.0 }
  0x3b   : > { %v249_v13 = vadd.f32 %v248_v10, %v247_v7  ;;  %272 = vadd.xlane.f32.xlu1 %v271_v9 }
  0x3d   : > { %250 = vadd.xlane.f32.xlu0 %v249_v13 }
  0x41   : > { %261 = vadd.xlane.f32.xlu0 %v260_v14 }
  0xc4   : > { %v273_v16 = vpop.xlane.xlu1 %272 }
  0xc6   : > { %v251_v15 = vpop.xlane.xlu0 %250 }
  0xc7   : > { %253 = vst.msk [vmem:[%s219_s7] sm:$0xf] %vm252_vm1, %v251_v15 }
  0xca   : > { %v262_v17 = vpop.xlane.xlu0 %261 }
  0xcb   : > { %264 = vst.msk [vmem:[%s219_s7] sm:$0xf] %vm263_vm2, %v262_v17 }
  0xcc   : > { %275 = vst.msk [vmem:[%s219_s7] sm:$0xf] %vm274_vm3, %v273_v16 }
  0xcd PF: > { %s18_s14 = sadd.s32 1, %s568_s14   ;;  %s720_s9 = smov %s552_s10 }
  0xce   : > { %p15_p9 = scmp.ge.s32.totalorder %s18_s14, 4   ;;  %s721_s10 = smov %s556_s11 }
  0xcf   : > { %s722_s11 = smov %s636_s21  ;;  %s723_s12 = smov %s564_s13 }
  0xd0   : > { %s724_s13 = smov %s726_s16  ;;  %17 = sbr.rel (!%p15_p9) target bundleno = 6 (0x6), region = 89 }
  0xd5   :  { %295 = vsyncpa [#allocation6], 1 }
  0xd6   :  { %297 = vsyncpa [#allocation6 + $0x1], 1 }
  0xd7   :  { %298 = vsyncpa [#allocation8], 1 }
  0xd8   :  { %300 = vsyncpa [#allocation8 + $0x1], 1 }

</bundles_post_ra>
